<compile_context>
chip_gen: v5e
topology: v5e:2x2
jax: 0.10.0
libtpu: 0.0.40
codegen_flags: <defaults>
</compile_context>

<pallas_src>
import functools

import jax
import jax.numpy as jnp
from jax.experimental import pallas as pl
from jax.experimental.pallas import tpu as pltpu


# ----------------------------- Pallas kernel -----------------------------

def _fc_continue_kernel(x_ref, w_ref, b_ref, out_ref, *, in_size, hd, out_dim):
    """x_ref  : (TB, in_size) f32 raw input tile
       w_ref  : (5, P, P) bf16 packed/fused weights (P = hd + hd//2)
       b_ref  : (5, 1, P) f32 packed/fused biases
       out_ref: (TB, 2*out_dim) f32  ->  [mean || cov]
    """
    def layer(h, li, w):
        # bf16 operands on the MXU, f32 accumulation, f32 bias add.
        z = jnp.dot(h.astype(jnp.bfloat16), w, preferred_element_type=jnp.float32)
        return z + b_ref[li]

    x = x_ref[...]                                              # (TB, in_size) f32

    # Layer 1: only the first `in_size` rows of the packed W1 are meaningful,
    # so slice them statically (in_size is a multiple of 8 -> aligned sublanes).
    h = jnp.maximum(layer(x, 0, w_ref[0, :in_size, :]), 0.0)    # relu(fc1), both branches
    h = jnp.maximum(layer(h, 1, w_ref[1]), 0.0)                 # relu(fc2)
    h = jnp.maximum(layer(h, 2, w_ref[2]), 0.0)                 # relu(fc3)

    z4 = layer(h, 3, w_ref[3])          # cols [:hd] mean pre-act4, [hd:hd+out] cov pre-act4
    cov = jnp.exp(z4[:, hd:hd + out_dim])

    # Rows hd..P-1 of W5 are zero (asserted in pack_params), so relu over the
    # full 48-wide tile before layer 5 cannot leak cov columns into the mean.
    z5 = layer(jnp.maximum(z4, 0.0), 4, w_ref[4])

    # Two direct sub-stores instead of concatenate + single store.
    out_ref[:, :out_dim] = z5[:, :out_dim].astype(out_ref.dtype)
    out_ref[:, out_dim:] = cov.astype(out_ref.dtype)


def _choose_batch_tile(batch):
    """Largest tile (multiple of 8, <=1024 rows) that still gives >=2 grid
    steps for batch >= 16, so v7x's two TensorCores both get work."""
    if batch <= 8:
        return 8
    return max(8, min(1024, 8 * ((batch // 2) // 8)))


def fc_continue_forward(state, packed_w, packed_b, *,
                        input_size, output_size, hidden_dim):
    """state: [B, input_size] f32; returns (mean [B, out], cov [B, out])."""
    B = state.shape[0]
    P = hidden_dim + hidden_dim // 2          # fused hidden width (48)

    TB = _choose_batch_tile(B)
    Bp = pl.cdiv(B, TB) * TB                  # pad batch up instead of asserting
    x = state if Bp == B else jnp.pad(state, ((0, Bp - B), (0, 0)))
    grid = (Bp // TB,)

    out = pl.pallas_call(
        functools.partial(_fc_continue_kernel,
                          in_size=input_size, hd=hidden_dim, out_dim=output_size),
        out_shape=jax.ShapeDtypeStruct((Bp, 2 * output_size), jnp.float32),
        grid_spec=pltpu.PrefetchScalarGridSpec(
            num_scalar_prefetch=0,
            grid=grid,
            in_specs=[
                pl.BlockSpec((TB, input_size), lambda i: (i, 0)),   # raw state tile
                pl.BlockSpec((5, P, P), lambda i: (0, 0, 0)),       # all weights (grid-invariant)
                pl.BlockSpec((5, 1, P), lambda i: (0, 0, 0)),       # all biases  (grid-invariant)
            ],
            out_specs=pl.BlockSpec((TB, 2 * output_size), lambda i: (i, 0)),
        ),
        compiler_params=pltpu.CompilerParams(
            dimension_semantics=("parallel",)),
    )(x, packed_w, packed_b)

    out = out[:B]
    return out[:, :output_size], out[:, output_size:]


# ------------------------- parameter construction ------------------------

def _orthogonal(key, shape):
    """Orthogonal init (matches nn.init.orthogonal_ semantics, gain=1)."""
    rows, cols = shape
    n = max(rows, cols)
    a = jax.random.normal(key, (n, n), dtype=jnp.float32)
    q, r = jnp.linalg.qr(a)
    d = jnp.diag(r)
    q = q * jnp.where(d >= 0, 1.0, -1.0)[None, :]   # no zero-sign risk
    return q[:rows, :cols]


def init_params(key, input_size, output_size, hidden_dim):
    """Per-layer f32 params; weights stored as [in, out], biases as [1, out]."""
    hd2 = hidden_dim // 2
    layer_io = {
        "m1": (input_size, hidden_dim),
        "m2": (hidden_dim, hidden_dim),
        "m3": (hidden_dim, hidden_dim),
        "m4": (hidden_dim, hidden_dim),
        "m5": (hidden_dim, output_size),
        "c1": (input_size, hd2),
        "c2": (hd2, hd2),
        "c3": (hd2, hd2),
        "c4": (hd2, output_size),
    }
    params = {}
    keys = jax.random.split(key, 2 * len(layer_io))
    for idx, (name, (in_f, out_f)) in enumerate(layer_io.items()):
        kw, kb = keys[2 * idx], keys[2 * idx + 1]
        w = _orthogonal(kw, (out_f, in_f))                     # PyTorch layout [out, in]
        params[name[0] + "w" + name[1]] = jnp.asarray(w.T, jnp.float32)  # store [in, out]
        bound = 1.0 / jnp.sqrt(jnp.float32(in_f))              # PyTorch default bias init
        params[name[0] + "b" + name[1]] = jax.random.uniform(
            kb, (1, out_f), jnp.float32, -bound, bound)
    return params


def pack_params(p, input_size, output_size, hidden_dim):
    """Fuse the two branches into (5, P, P) bf16 weights + (5, 1, P) f32 biases."""
    HD = hidden_dim
    H2 = hidden_dim // 2
    P = HD + H2
    OUT = output_size

    W = jnp.zeros((5, P, P), jnp.float32)
    b = jnp.zeros((5, 1, P), jnp.float32)

    # layer 1: concat on the shared input
    W = W.at[0, :input_size, :HD].set(p["mw1"])
    W = W.at[0, :input_size, HD:HD + H2].set(p["cw1"])
    b = b.at[0, 0, :HD].set(p["mb1"][0])
    b = b.at[0, 0, HD:HD + H2].set(p["cb1"][0])

    # layers 2 and 3: block-diagonal
    for li, (mw, mb, cw, cb) in ((1, ("mw2", "mb2", "cw2", "cb2")),
                                 (2, ("mw3", "mb3", "cw3", "cb3"))):
        W = W.at[li, :HD, :HD].set(p[mw])
        W = W.at[li, HD:HD + H2, HD:HD + H2].set(p[cw])
        b = b.at[li, 0, :HD].set(p[mb][0])
        b = b.at[li, 0, HD:HD + H2].set(p[cb][0])

    # layer 4: mean fc4 (HD,HD) block-diag with cov fc4 (H2,OUT)
    W = W.at[3, :HD, :HD].set(p["mw4"])
    W = W.at[3, HD:HD + H2, HD:HD + OUT].set(p["cw4"])
    b = b.at[3, 0, :HD].set(p["mb4"][0])
    b = b.at[3, 0, HD:HD + OUT].set(p["cb4"][0])

    # layer 5: mean fc5 only (rows HD.. stay zero so the cov columns can't leak)
    W = W.at[4, :HD, :OUT].set(p["mw5"])
    b = b.at[4, 0, :OUT].set(p["mb5"][0])

    # Invariants the kernel's full-width relu before layer 5 depends on.
    assert float(jnp.max(jnp.abs(W[4, HD:, :]))) == 0.0, "W5 cov rows must be zero"
    assert float(jnp.max(jnp.abs(W[3, :, HD + OUT:]))) == 0.0, "W4 padding cols must be zero"

    return W.astype(jnp.bfloat16), b


# ------------------------------ reference --------------------------------

def reference_forward(state, p):
    """Pure-JAX reference mirroring the kernel's bf16-operand / f32-accum matmuls."""
    def lin(h, w, b):
        return jnp.dot(h.astype(jnp.bfloat16), w.astype(jnp.bfloat16),
                       preferred_element_type=jnp.float32) + b
    m = jax.nn.relu(lin(state, p["mw1"], p["mb1"]))
    m = jax.nn.relu(lin(m, p["mw2"], p["mb2"]))
    m = jax.nn.relu(lin(m, p["mw3"], p["mb3"]))
    m = jax.nn.relu(lin(m, p["mw4"], p["mb4"]))
    mean = lin(m, p["mw5"], p["mb5"])
    c = jax.nn.relu(lin(state, p["cw1"], p["cb1"]))
    c = jax.nn.relu(lin(c, p["cw2"], p["cb2"]))
    c = jax.nn.relu(lin(c, p["cw3"], p["cb3"]))
    cov = jnp.exp(lin(c, p["cw4"], p["cb4"]))
    return mean, cov


# --------------------------------- main -----------------------------------

if __name__ == "__main__":
    INPUT_SIZE = 16
    OUTPUT_SIZE = 8
    HIDDEN_DIM = 32
    BATCH = 8
    # action_scale is stored by the PyTorch module but unused in forward().

    key = jax.random.PRNGKey(0)
    k_params, k_state = jax.random.split(key)

    params = init_params(k_params, INPUT_SIZE, OUTPUT_SIZE, HIDDEN_DIM)
    packed_w, packed_b = pack_params(params, INPUT_SIZE, OUTPUT_SIZE, HIDDEN_DIM)
    state = jax.random.normal(k_state, (BATCH, INPUT_SIZE), dtype=jnp.float32)

    fwd = jax.jit(functools.partial(
        fc_continue_forward,
        input_size=INPUT_SIZE, output_size=OUTPUT_SIZE, hidden_dim=HIDDEN_DIM))

    mean, cov = fwd(state, packed_w, packed_b)
    mean, cov = jax.block_until_ready((mean, cov))

    ref_mean, ref_cov = reference_forward(state, params)

    assert mean.shape == (BATCH, OUTPUT_SIZE)
    assert cov.shape == (BATCH, OUTPUT_SIZE)
    assert jnp.allclose(mean, ref_mean, atol=5e-3, rtol=5e-3), (
        float(jnp.max(jnp.abs(mean - ref_mean))))
    assert jnp.allclose(cov, ref_cov, atol=5e-3, rtol=5e-3), (
        float(jnp.max(jnp.abs(cov - ref_cov))))
    assert bool(jnp.all(cov > 0.0))

    print("KERNEL_OK")
</pallas_src>

<mosaic_0001>
module attributes {stable_mosaic.version = 11 : i64} {
  func.func @_fc_continue_kernel(%arg0: i32, %arg1: memref<8x16xf32, #tpu.memory_space<vmem>>, %arg2: memref<5x48x48xbf16, #tpu.memory_space<vmem>>, %arg3: memref<5x1x48xf32, #tpu.memory_space<vmem>>, %arg4: memref<8x16xf32, #tpu.memory_space<vmem>>) attributes {dimension_semantics = [#tpu.dimension_semantics<parallel>], iteration_bounds = array<i64: 1>, scalar_prefetch = 0 : i64, scratch_operands = 0 : i64, tpu.core_type = #tpu.core_type<tc>, window_params = [{transform_indices = @transform_0, window_bounds = array<i64: 8, 16>}, {pipeline_mode = #tpu.pipeline_mode<synchronous>, transform_indices = @transform_1, window_bounds = array<i64: 5, 48, 48>}, {pipeline_mode = #tpu.pipeline_mode<synchronous>, transform_indices = @transform_2, window_bounds = array<i64: 5, 1, 48>}, {transform_indices = @transform_3, window_bounds = array<i64: 8, 16>}]} {
    %c0 = arith.constant 0 : index
    %c0_0 = arith.constant 0 : index
    %0 = vector.load %arg1[%c0, %c0_0] : memref<8x16xf32, #tpu.memory_space<vmem>>, vector<8x16xf32>
    %c0_1 = arith.constant 0 : index
    %c0_2 = arith.constant 0 : index
    %c0_3 = arith.constant 0 : index
    %1 = vector.load %arg2[%c0_1, %c0_2, %c0_3] : memref<5x48x48xbf16, #tpu.memory_space<vmem>>, vector<1x16x48xbf16>
    %2 = vector.shape_cast %1 : vector<1x16x48xbf16> to vector<16x48xbf16>
    %3 = arith.truncf %0 : vector<8x16xf32> to vector<8x16xbf16>
    %cst = arith.constant dense<0.000000e+00> : vector<8x48xf32>
    %4 = tpu.matmul %3, %2, %cst {dimension_numbers = #tpu.dot_dimension_numbers<[1], [0], [0], [1], [0, 0, 1, 1], [], []>} : vector<8x16xbf16>, vector<16x48xbf16>, vector<8x48xf32> -> vector<8x48xf32>
    %c0_4 = arith.constant 0 : index
    %c0_5 = arith.constant 0 : index
    %c0_6 = arith.constant 0 : index
    %5 = vector.load %arg3[%c0_4, %c0_5, %c0_6] : memref<5x1x48xf32, #tpu.memory_space<vmem>>, vector<1x1x48xf32>
    %6 = vector.shape_cast %5 : vector<1x1x48xf32> to vector<1x48xf32>
    %7 = vector.broadcast %6 : vector<1x48xf32> to vector<8x48xf32>
    %8 = arith.addf %4, %7 : vector<8x48xf32>
    %cst_7 = arith.constant 0.000000e+00 : f32
    %9 = vector.broadcast %cst_7 : f32 to vector<8x48xf32>
    %10 = arith.maximumf %8, %9 : vector<8x48xf32>
    %c1 = arith.constant 1 : index
    %c0_8 = arith.constant 0 : index
    %c0_9 = arith.constant 0 : index
    %11 = vector.load %arg2[%c1, %c0_8, %c0_9] : memref<5x48x48xbf16, #tpu.memory_space<vmem>>, vector<1x48x48xbf16>
    %12 = vector.shape_cast %11 : vector<1x48x48xbf16> to vector<48x48xbf16>
    %13 = arith.truncf %10 : vector<8x48xf32> to vector<8x48xbf16>
    %cst_10 = arith.constant dense<0.000000e+00> : vector<8x48xf32>
    %14 = tpu.matmul %13, %12, %cst_10 {dimension_numbers = #tpu.dot_dimension_numbers<[1], [0], [0], [1], [0, 0, 1, 1], [], []>} : vector<8x48xbf16>, vector<48x48xbf16>, vector<8x48xf32> -> vector<8x48xf32>
    %c1_11 = arith.constant 1 : index
    %c0_12 = arith.constant 0 : index
    %c0_13 = arith.constant 0 : index
    %15 = vector.load %arg3[%c1_11, %c0_12, %c0_13] : memref<5x1x48xf32, #tpu.memory_space<vmem>>, vector<1x1x48xf32>
    %16 = vector.shape_cast %15 : vector<1x1x48xf32> to vector<1x48xf32>
    %17 = vector.broadcast %16 : vector<1x48xf32> to vector<8x48xf32>
    %18 = arith.addf %14, %17 : vector<8x48xf32>
    %cst_14 = arith.constant 0.000000e+00 : f32
    %19 = vector.broadcast %cst_14 : f32 to vector<8x48xf32>
    %20 = arith.maximumf %18, %19 : vector<8x48xf32>
    %c2 = arith.constant 2 : index
    %c0_15 = arith.constant 0 : index
    %c0_16 = arith.constant 0 : index
    %21 = vector.load %arg2[%c2, %c0_15, %c0_16] : memref<5x48x48xbf16, #tpu.memory_space<vmem>>, vector<1x48x48xbf16>
    %22 = vector.shape_cast %21 : vector<1x48x48xbf16> to vector<48x48xbf16>
    %23 = arith.truncf %20 : vector<8x48xf32> to vector<8x48xbf16>
    %cst_17 = arith.constant dense<0.000000e+00> : vector<8x48xf32>
    %24 = tpu.matmul %23, %22, %cst_17 {dimension_numbers = #tpu.dot_dimension_numbers<[1], [0], [0], [1], [0, 0, 1, 1], [], []>} : vector<8x48xbf16>, vector<48x48xbf16>, vector<8x48xf32> -> vector<8x48xf32>
    %c2_18 = arith.constant 2 : index
    %c0_19 = arith.constant 0 : index
    %c0_20 = arith.constant 0 : index
    %25 = vector.load %arg3[%c2_18, %c0_19, %c0_20] : memref<5x1x48xf32, #tpu.memory_space<vmem>>, vector<1x1x48xf32>
    %26 = vector.shape_cast %25 : vector<1x1x48xf32> to vector<1x48xf32>
    %27 = vector.broadcast %26 : vector<1x48xf32> to vector<8x48xf32>
    %28 = arith.addf %24, %27 : vector<8x48xf32>
    %cst_21 = arith.constant 0.000000e+00 : f32
    %29 = vector.broadcast %cst_21 : f32 to vector<8x48xf32>
    %30 = arith.maximumf %28, %29 : vector<8x48xf32>
    %c3 = arith.constant 3 : index
    %c0_22 = arith.constant 0 : index
    %c0_23 = arith.constant 0 : index
    %31 = vector.load %arg2[%c3, %c0_22, %c0_23] : memref<5x48x48xbf16, #tpu.memory_space<vmem>>, vector<1x48x48xbf16>
    %32 = vector.shape_cast %31 : vector<1x48x48xbf16> to vector<48x48xbf16>
    %33 = arith.truncf %30 : vector<8x48xf32> to vector<8x48xbf16>
    %cst_24 = arith.constant dense<0.000000e+00> : vector<8x48xf32>
    %34 = tpu.matmul %33, %32, %cst_24 {dimension_numbers = #tpu.dot_dimension_numbers<[1], [0], [0], [1], [0, 0, 1, 1], [], []>} : vector<8x48xbf16>, vector<48x48xbf16>, vector<8x48xf32> -> vector<8x48xf32>
    %c3_25 = arith.constant 3 : index
    %c0_26 = arith.constant 0 : index
    %c0_27 = arith.constant 0 : index
    %35 = vector.load %arg3[%c3_25, %c0_26, %c0_27] : memref<5x1x48xf32, #tpu.memory_space<vmem>>, vector<1x1x48xf32>
    %36 = vector.shape_cast %35 : vector<1x1x48xf32> to vector<1x48xf32>
    %37 = vector.broadcast %36 : vector<1x48xf32> to vector<8x48xf32>
    %38 = arith.addf %34, %37 : vector<8x48xf32>
    %39 = vector.extract_strided_slice %38 {offsets = [0, 32], sizes = [8, 8], strides = [1, 1]} : vector<8x48xf32> to vector<8x8xf32>
    %40 = math.exp %39 : vector<8x8xf32>
    %cst_28 = arith.constant 0.000000e+00 : f32
    %41 = vector.broadcast %cst_28 : f32 to vector<8x48xf32>
    %42 = arith.maximumf %38, %41 : vector<8x48xf32>
    %c4 = arith.constant 4 : index
    %c0_29 = arith.constant 0 : index
    %c0_30 = arith.constant 0 : index
    %43 = vector.load %arg2[%c4, %c0_29, %c0_30] : memref<5x48x48xbf16, #tpu.memory_space<vmem>>, vector<1x48x48xbf16>
    %44 = vector.shape_cast %43 : vector<1x48x48xbf16> to vector<48x48xbf16>
    %45 = arith.truncf %42 : vector<8x48xf32> to vector<8x48xbf16>
    %cst_31 = arith.constant dense<0.000000e+00> : vector<8x48xf32>
    %46 = tpu.matmul %45, %44, %cst_31 {dimension_numbers = #tpu.dot_dimension_numbers<[1], [0], [0], [1], [0, 0, 1, 1], [], []>} : vector<8x48xbf16>, vector<48x48xbf16>, vector<8x48xf32> -> vector<8x48xf32>
    %c4_32 = arith.constant 4 : index
    %c0_33 = arith.constant 0 : index
    %c0_34 = arith.constant 0 : index
    %47 = vector.load %arg3[%c4_32, %c0_33, %c0_34] : memref<5x1x48xf32, #tpu.memory_space<vmem>>, vector<1x1x48xf32>
    %48 = vector.shape_cast %47 : vector<1x1x48xf32> to vector<1x48xf32>
    %49 = vector.broadcast %48 : vector<1x48xf32> to vector<8x48xf32>
    %50 = arith.addf %46, %49 : vector<8x48xf32>
    %51 = vector.extract_strided_slice %50 {offsets = [0, 0], sizes = [8, 8], strides = [1, 1]} : vector<8x48xf32> to vector<8x8xf32>
    %c0_35 = arith.constant 0 : index
    %c0_36 = arith.constant 0 : index
    %52 = vector.load %arg4[%c0_35, %c0_36] : memref<8x16xf32, #tpu.memory_space<vmem>>, vector<8x8xf32>
    tpu.vector_store %arg4[%c0_35, %c0_36], %51 {strides = array<i32>} : memref<8x16xf32, #tpu.memory_space<vmem>>, vector<8x8xf32>,
    %c0_37 = arith.constant 0 : index
    %c8 = arith.constant 8 : index
    %53 = vector.load %arg4[%c0_37, %c8] : memref<8x16xf32, #tpu.memory_space<vmem>>, vector<8x8xf32>
    tpu.vector_store %arg4[%c0_37, %c8], %40 {strides = array<i32>} : memref<8x16xf32, #tpu.memory_space<vmem>>, vector<8x8xf32>,
    return
  }
  func.func @transform_0(%arg0: i32) -> (i32, i32) {
    %c0_i32 = arith.constant 0 : i32
    %c0_i32_0 = arith.constant 0 : i32
    return %arg0, %c0_i32 : i32, i32
  }
  func.func @transform_1(%arg0: i32) -> (i32, i32, i32) {
    %c0_i32 = arith.constant 0 : i32
    %c0_i32_0 = arith.constant 0 : i32
    %c0_i32_1 = arith.constant 0 : i32
    %c0_i32_2 = arith.constant 0 : i32
    return %c0_i32, %c0_i32_0, %c0_i32_1 : i32, i32, i32
  }
  func.func @transform_2(%arg0: i32) -> (i32, i32, i32) {
    %c0_i32 = arith.constant 0 : i32
    %c0_i32_0 = arith.constant 0 : i32
    %c0_i32_1 = arith.constant 0 : i32
    %c0_i32_2 = arith.constant 0 : i32
    return %c0_i32, %c0_i32_0, %c0_i32_1 : i32, i32, i32
  }
  func.func @transform_3(%arg0: i32) -> (i32, i32) {
    %c0_i32 = arith.constant 0 : i32
    %c0_i32_0 = arith.constant 0 : i32
    return %arg0, %c0_i32 : i32, i32
  }
}

</mosaic_0001>

<bundles_post_ra>
// kernel: fc_continue_forward.1
= control target key start
LH: loop header
LB: loop body
LE: loop exit
PB: predicated region body
PF: predicated region fallthrough
CT: control target
= control target key end

     0   :  { %8 = vsyncpa [#allocation3], 0  ;;  %s508_s0 = inlined_call_operand.hbm [shape: f32[8,16], index: 0, kind: input, shape index: {}]   ;;  %s509_s1 = inlined_call_operand.hbm [shape: bf16[5,48,48], index: 1, kind: input, shape index: {}]   ;;  %s510_s2 = inlined_call_operand.hbm [shape: f32[5,1,48], index: 2, kind: input, shape index: {}]   ;;  %s511_s3 = inlined_call_operand.vmem [shape: f32[8,16], index: 3, kind: output, shape index: {}]  }
   0x1   :  { %9 = vsyncpa [#allocation5], 0  ;;  %s25_s14 = sshll.u32 %s509_s1, 4  ;;  %s461_s15 = smov [#allocation4]   ;;  %s26_s14 = int_to_ptr.hbm [resolvable:$true] %s25_s14 }
   0x2   :  { %s27_s16 = sshll.u32 %s461_s15, 4  ;;  %s15_s19 = sshll.u32 %s508_s0, 4  ;;  %s28_s16 = int_to_ptr.vmem [resolvable:$true] %s27_s16  ;;  %s16_s19 = int_to_ptr.hbm [resolvable:$true] %s15_s19 }
   0x3   :  { %s462_s20 = smov 64   ;;  %s463_s21 = smov 4  }
   0x4   :  { %33 = dma.hbm_to_vmem [thread:$0]  %s26_s14, 1920, %s28_s16, [#allocation5], %s462_s20, %s462_s20, %s463_s21  }
   0x5   :  { %s464_s22 = smov [#allocation2]   ;;  %s38_s26 = sshll.u32 %s510_s2, 4  ;;  %s39_s26 = int_to_ptr.hbm [resolvable:$true] %s38_s26 }
   0x6   :  { %s17_s23 = sshll.u32 %s464_s22, 4  ;;  %s465_s1 = smov [#allocation6]   ;;  %s18_s23 = int_to_ptr.vmem [resolvable:$true] %s17_s23 }
   0x7   :  { %20 = dma.hbm_to_vmem [thread:$0]  %s16_s19, 128, %s18_s23, [#allocation3]  }
   0x8   :  { %s40_s27 = sshll.u32 %s465_s1, 4  ;;  %s466_s28 = smov 16   ;;  %s41_s27 = int_to_ptr.vmem [resolvable:$true] %s40_s27 }
   0x9   :  { %s467_s29 = smov 1  }
   0xa   :  { %46 = dma.hbm_to_vmem [thread:$0]  %s39_s26, 80, %s41_s27, [#allocation5], %s466_s28, %s466_s28, %s467_s29  }
   0xb   :  { %457 = dma.done.wait [#allocation3], 128  }
   0xc   :  { %458 = vsyncadd [#allocation3], 4294967168 }
   0xd   :  { %459 = dma.done.wait [#allocation5], 2000  }
   0xe   :  { %460 = vsyncadd [#allocation5], 4294965296  ;;  %v357_v0 = vld [vmem:[#allocation4] sm:$0xff]  ;;  %v60_v1 = vld [vmem:[#allocation2] sm:$0xff]  ;;  %vm74_vm0 = vcmask 130048   ;;  %vm123_vm1 = vcmask 392192  }
   0xf   :  { %v360_v2 = vld [vmem:[#allocation4 + $0x28] sm:$0xff]  ;;  %v63_v3 = vpack.c.bf16 %v60_v1, %v60_v1  ;;  %85 = vmatpush.bf16.msra.mxu0 %v357_v0  ;;  %v359_v4 = vld [vmem:[#allocation4 + $0x20] sm:$0xff]  ;;  %v358_v5 = vld [vmem:[#allocation4 + $0x18] sm:$0xff]  ;;  %s468_s0 = smov 104   ;;  %vm286_vm2 = vcmask 64512   ;;  %vm292_vm3 = vcmask 130112  }
  0x10   :  { %132 = vmatpush.bf16.msra.mxu1 %v360_v2  ;;  %v363_v6 = vld [vmem:[#allocation4 + $0x40] sm:$0xff]  ;;  %v378_v7 = vld [vmem:[#allocation6] ss:$0 sm:$0xff]  ;;  %v361_v14 = vld [vmem:[#allocation4 + $0x30] sm:$0xff] }
  0x11   :  { %180 = vmatpush.bf16.msra.mxu2 %v363_v6  ;;  %v362_v13 = vld [vmem:[#allocation4 + $0x38] sm:$0xff]  ;;  %v365_v22 = vld [vmem:[#allocation4 + $0x50] sm:$0xff]  ;;  %v364_v23 = vld [vmem:[#allocation4 + $0x48] sm:$0xff] }
  0x12   :  { %304 = vmatmul.msk.bf16.vlgmr.msra.gmra.mxu0 %vm74_vm0, %v63_v3  ;;  %v366_v15 = vld [vmem:[#allocation4 + $0x58] sm:$0xff]  ;;  %v369_v24 = vld [vmem:[#allocation4 + $0x70] sm:$0xff]  ;;  %v368_v25 = vld [vmem:[#allocation4 + $0x68] sm:$0xff] }
  0x13   :  { %228 = vmatpush.bf16.msra.mxu3 %v366_v15  ;;  %v379_v16 = vld [vmem:[#allocation6 + $0x1] ss:$0 sm:$0xff]  ;;  %278 = vmatpush.bf16.msrb.mxu0 %v369_v24  ;;  %v380_v26 = vld [vmem:[#allocation6 + $0x2] ss:$0 sm:$0xff]  ;;  %v367_v32 = vld [vmem:[#allocation4 + $0x60] sm:$0xff] }
  0x14   :  { %133 = vmatpush.bf16.msra.mxu1 %v359_v4  ;;  %v381_v33 = vld [vmem:[#allocation6 + $0x3] ss:$0 sm:$0xff]  ;;  %v382_v41 = vld [vmem:[#allocation6 + $0x4] ss:$0 sm:$0xff] }
  0x15   :  { %181 = vmatpush.bf16.msra.mxu2 %v362_v13 }
  0x17   :  { %229 = vmatpush.bf16.msra.mxu3 %v365_v22  ;;  %279 = vmatpush.bf16.msrb.mxu0 %v368_v25 }
  0x18   :  { %134 = vmatpush.bf16.msra.mxu1 %v358_v5 }
  0x19   :  { %182 = vmatpush.bf16.msra.mxu2 %v361_v14 }
  0x1b   :  { %230 = vmatpush.bf16.msra.mxu3 %v364_v23  ;;  %280 = vmatpush.bf16.msrb.mxu0 %v367_v32 }
  0x8f   :  { %v87_v8 = vpop.f32.mrf.mxu0 }
  0x90   :  { %v88_v9 = vadd.f32 %v378_v7, %v87_v8 }
  0x92   :  { %v91_v10 = vmax.f32 %v88_v9, 0.0 }
  0x94   :  { %v99_v11 = vpack.c.bf16 %v91_v10, %v91_v10 }
  0x96   :  { %317 = vmatmul.msk.bf16.vlgmr.msra.gmra.mxu1 %vm123_vm1, %v99_v11 }
  0x97   :  { %v89_v12 = vpop.f32.mrf.mxu0 }
 0x113   :  { %v136_v17 = vpop.f32.mrf.mxu1 }
 0x114   :  { %v137_v18 = vadd.f32 %v379_v16, %v136_v17 }
 0x116   :  { %v140_v19 = vmax.f32 %v137_v18, 0.0 }
 0x118   :  { %v148_v20 = vpack.c.bf16 %v140_v19, %v140_v19 }
 0x11a   :  { %330 = vmatmul.msk.bf16.vlgmr.msra.gmra.mxu2 %vm123_vm1, %v148_v20 }
 0x11b   :  { %v138_v21 = vpop.f32.mrf.mxu1 }
 0x19d   :  { %v184_v27 = vpop.f32.mrf.mxu2 }
 0x19e   :  { %v185_v28 = vadd.f32 %v380_v26, %v184_v27 }
 0x1a0   :  { %v188_v29 = vmax.f32 %v185_v28, 0.0 }
 0x1a2   :  { %v196_v30 = vpack.c.bf16 %v188_v29, %v188_v29 }
 0x1a4   :  { %343 = vmatmul.msk.bf16.vlgmr.msra.gmra.mxu3 %vm123_vm1, %v196_v30 }
 0x1a5   :  { %v186_v31 = vpop.f32.mrf.mxu2 }
 0x227   :  { %v232_v34 = vpop.f32.mrf.mxu3 }
 0x228   :  { %v233_v35 = vadd.f32 %v381_v33, %v232_v34 }
 0x22a   :  { %v236_v36 = vmul.f32 1.442695, %v233_v35  ;;  %v238_v37 = vmax.f32 %v233_v35, 0.0 }
 0x22c   :  { %383 = vpow2.f32 %v236_v36  ;;  %v246_v38 = vpack.c.bf16 %v238_v37, %v238_v37 }
 0x22e   :  { %356 = vmatmul.msk.bf16.vlgmr.msrb.gmra.mxu0 %vm123_vm1, %v246_v38 }
 0x22f   :  { %v234_v39 = vpop.f32.mrf.mxu3 }
 0x232   :  { %v384_v40 = vpop.eup %383 }
 0x233   :  { %289 = vrot.lane.b32.xlu0 %v384_v40, %s468_s0 }
 0x2a5   :  { %v290_v44 = vpop.permute.xlu0 %289 }
 0x2ab   :  { %v282_v42 = vpop.f32.mrf.mxu0 }
 0x2ac   :  { %v283_v43 = vadd.f32 %v382_v41, %v282_v42 }
 0x2ae   :  { %287 = vst.msk [vmem:[%s511_s3] sm:$0xff] %vm286_vm2, %v283_v43 }
 0x2af   :  { %293 = vst.msk [vmem:[%s511_s3] sm:$0xff] %vm292_vm3, %v290_v44 }
 0x2b3   :  { %v284_v45 = vpop.f32.mrf.mxu0 }
 0x2b4   :  { %298 = vsyncpa [#allocation3], 1 }
 0x2b5   :  { %299 = vsyncpa [#allocation5], 1 }

</bundles_post_ra>
